<compile_context>
chip_gen: v7x
topology: tpu7x:2x2x1
jax: 0.10.0
libtpu: 0.0.40
codegen_flags: <defaults>
</compile_context>

<pallas_src>
import jax
import jax.numpy as jnp
from jax.experimental import pallas as pl
from jax.experimental.pallas import tpu as pltpu


def _round_up(x, m):
    return ((x + m - 1) // m) * m


def _vn_maxpool_kernel(x_ref, wb_ref, r_ref, rt_ref, s_ref, o_ref):
    """One grid step over a [TM, D*C] tile of flattened points.

    x_ref : [TM, D*C]   points, per-point (D, C) slab flattened into lanes
    wb_ref: [D*C, D*C]  kron(I_D, W.T) block-diagonal  -> d = x @ wb
    r_ref : [D*C, C]    stacked identities             -> reduces the D axis
    rt_ref: [C, D*C]    r transposed                   -> broadcasts one-hot to D slots
    s_ref : [D*C, D]    kron(I_D, ones(C,1))           -> per-D-slot channel reduction
    o_ref : [TM, D]     pooled output (winning channel's D-vector)
    """
    x = x_ref[...].astype(jnp.float32)                    # [TM, DC]
    wb = wb_ref[...]
    C = r_ref.shape[1]

    # d = map_to_dir(x): per-point Linear over C; the block-diagonal weight
    # folds the D axis into the matmul, so no in-kernel reshape is needed.
    d = jnp.dot(x.astype(wb.dtype), wb,
                preferred_element_type=jnp.float32)       # [TM, DC]

    # dotprod over the D axis: dot[m, e] = sum_v (x*d)[m, v*C + e]  (as a matmul).
    prod = x * d                                          # [TM, DC]
    dot = jnp.dot(prod, r_ref[...],
                  preferred_element_type=jnp.float32)     # [TM, C]

    # argmax over channels (first index on ties, matching torch/jnp argmax).
    maxv = jnp.max(dot, axis=-1, keepdims=True)           # [TM, 1]
    iota = jax.lax.broadcasted_iota(jnp.int32, dot.shape, 1)
    idx = jnp.min(jnp.where(dot == maxv, iota, C), axis=-1, keepdims=True)
    onehot = (iota == idx).astype(jnp.float32)            # [TM, C]
    # NOTE: if an entire dot row is NaN the one-hot is all zeros and the output
    # row is 0 (torch would still pick an index). Finite inputs assumed.

    # Gather the winning channel: broadcast the one-hot across the D slots,
    # mask, and reduce each slot -- both steps ride the (otherwise idle) MXU.
    onehot_big = jnp.dot(onehot, rt_ref[...],
                         preferred_element_type=jnp.float32)   # [TM, DC]
    x_max = jnp.dot(x * onehot_big, s_ref[...],
                    preferred_element_type=jnp.float32)        # [TM, D]

    o_ref[...] = x_max.astype(o_ref.dtype)


def vn_max_pool(x, w, *, tile_m=2048, matmul_dtype=None):
    """x: [B, N, D, C]; w: [C, C] torch-style Linear weight (out, in).

    Returns [B, N, D]. `tile_m` = points per grid step (sweep 1024-4096; it is
    clamped to the problem size and the tail is padded, so any B*N works).
    `matmul_dtype=jnp.bfloat16` casts only the Linear matmul operands
    (v6e/v7x MXU); the dot/argmax path always stays f32.
    """
    B, N, D, C = x.shape
    M = B * N
    DC = D * C

    # Free row-major reshape in HBM: [B, N, D, C] -> [M, D*C].
    x2 = x.reshape(M, DC)

    # Large tiles amortize per-grid-step overhead; clamp for small problems.
    tm = min(int(tile_m), _round_up(M, 8))
    tm = max(8, _round_up(tm, 8))
    m_pad = _round_up(M, tm)
    if m_pad != M:
        x2 = jnp.pad(x2, ((0, m_pad - M), (0, 0)))        # zero rows -> zero out

    f32 = jnp.float32
    wt = jnp.transpose(w).astype(f32)                             # [C, C]
    wb = jnp.kron(jnp.eye(D, dtype=f32), wt)                      # [DC, DC]
    if matmul_dtype is not None:
        wb = wb.astype(matmul_dtype)
    r = jnp.tile(jnp.eye(C, dtype=f32), (D, 1))                   # [DC, C]
    rt = jnp.transpose(r)                                         # [C, DC]
    s = jnp.kron(jnp.eye(D, dtype=f32), jnp.ones((C, 1), f32))    # [DC, D]

    grid = (pl.cdiv(m_pad, tm),)
    out = pl.pallas_call(
        _vn_maxpool_kernel,
        out_shape=jax.ShapeDtypeStruct((m_pad, D), x.dtype),
        grid_spec=pltpu.PrefetchScalarGridSpec(
            num_scalar_prefetch=0,
            grid=grid,
            in_specs=[
                pl.BlockSpec((tm, DC), lambda i: (i, 0)),   # points (streamed)
                pl.BlockSpec((DC, DC), lambda i: (0, 0)),   # block-diag W.T
                pl.BlockSpec((DC, C), lambda i: (0, 0)),    # D-axis reducer
                pl.BlockSpec((C, DC), lambda i: (0, 0)),    # one-hot broadcaster
                pl.BlockSpec((DC, D), lambda i: (0, 0)),    # channel reducer
            ],
            out_specs=pl.BlockSpec((tm, D), lambda i: (i, 0)),
        ),
        compiler_params=pltpu.CompilerParams(
            dimension_semantics=("parallel",),      # megacore split on v7x
            vmem_limit_bytes=32 * 1024 * 1024,
        ),
    )(x2, wb, r, rt, s)

    return out[:M].reshape(B, N, D)


def vn_max_pool_reference(x, w):
    """Pure-JAX reference mirroring the PyTorch forward exactly."""
    d = jnp.einsum("bndk,ek->bnde", x, w)                 # Linear over last dim
    dotprod = jnp.sum(x * d, axis=2, keepdims=True)       # [B, N, 1, C]
    idx = jnp.argmax(dotprod, axis=-1)                    # [B, N, 1]
    x_max = jnp.take_along_axis(x, idx[..., None], axis=-1)[..., 0]  # [B, N, D]
    return x_max


if __name__ == "__main__":
    B, N, D, C = 2, 16, 3, 32  # in_channels = 32

    key = jax.random.PRNGKey(0)
    kx, kw = jax.random.split(key)

    x = jax.random.normal(kx, (B, N, D, C), dtype=jnp.float32)
    # Deterministic Linear weight init (PyTorch-default-like uniform bound).
    bound = 1.0 / jnp.sqrt(jnp.float32(C))
    w = jax.random.uniform(kw, (C, C), dtype=jnp.float32,
                           minval=-bound, maxval=bound)

    out = vn_max_pool(x, w)
    out = jax.block_until_ready(out)

    ref = vn_max_pool_reference(x, w)
    assert out.shape == (B, N, D)
    assert jnp.allclose(out, ref, atol=1e-5, rtol=1e-5), "mismatch vs reference"

    print("KERNEL_OK")
</pallas_src>

<mosaic_0001>
module attributes {stable_mosaic.version = 11 : i64} {
  func.func @_vn_maxpool_kernel(%arg0: i32, %arg1: memref<32x96xf32, #tpu.memory_space<vmem>>, %arg2: memref<96x96xf32, #tpu.memory_space<vmem>>, %arg3: memref<96x32xf32, #tpu.memory_space<vmem>>, %arg4: memref<32x96xf32, #tpu.memory_space<vmem>>, %arg5: memref<96x3xf32, #tpu.memory_space<vmem>>, %arg6: memref<32x3xf32, #tpu.memory_space<vmem>>) attributes {dimension_semantics = [#tpu.dimension_semantics<parallel>], iteration_bounds = array<i64: 1>, scalar_prefetch = 0 : i64, scratch_operands = 0 : i64, tpu.core_type = #tpu.core_type<tc>, window_params = [{transform_indices = @transform_0, window_bounds = array<i64: 32, 96>}, {pipeline_mode = #tpu.pipeline_mode<synchronous>, transform_indices = @transform_1, window_bounds = array<i64: 96, 96>}, {pipeline_mode = #tpu.pipeline_mode<synchronous>, transform_indices = @transform_2, window_bounds = array<i64: 96, 32>}, {pipeline_mode = #tpu.pipeline_mode<synchronous>, transform_indices = @transform_3, window_bounds = array<i64: 32, 96>}, {pipeline_mode = #tpu.pipeline_mode<synchronous>, transform_indices = @transform_4, window_bounds = array<i64: 96, 3>}, {transform_indices = @transform_5, window_bounds = array<i64: 32, 3>}]} {
    %c0 = arith.constant 0 : index
    %c0_0 = arith.constant 0 : index
    %0 = vector.load %arg1[%c0, %c0_0] : memref<32x96xf32, #tpu.memory_space<vmem>>, vector<32x96xf32>
    %c0_1 = arith.constant 0 : index
    %c0_2 = arith.constant 0 : index
    %1 = vector.load %arg2[%c0_1, %c0_2] : memref<96x96xf32, #tpu.memory_space<vmem>>, vector<96x96xf32>
    %cst = arith.constant dense<0.000000e+00> : vector<32x96xf32>
    %2 = tpu.matmul %0, %1, %cst {dimension_numbers = #tpu.dot_dimension_numbers<[1], [0], [0], [1], [0, 0, 1, 1], [], []>} : vector<32x96xf32>, vector<96x96xf32>, vector<32x96xf32> -> vector<32x96xf32>
    %3 = arith.mulf %0, %2 : vector<32x96xf32>
    %c0_3 = arith.constant 0 : index
    %c0_4 = arith.constant 0 : index
    %4 = vector.load %arg3[%c0_3, %c0_4] : memref<96x32xf32, #tpu.memory_space<vmem>>, vector<96x32xf32>
    %cst_5 = arith.constant dense<0.000000e+00> : vector<32x32xf32>
    %5 = tpu.matmul %3, %4, %cst_5 {dimension_numbers = #tpu.dot_dimension_numbers<[1], [0], [0], [1], [0, 0, 1, 1], [], []>} : vector<32x96xf32>, vector<96x32xf32>, vector<32x32xf32> -> vector<32x32xf32>
    %cst_6 = arith.constant dense<0xFF800000> : vector<32xf32>
    %6 = vector.multi_reduction <maximumf>, %5, %cst_6 [1] : vector<32x32xf32> to vector<32xf32>
    %7 = vector.shape_cast %6 : vector<32xf32> to vector<32x1xf32>
    %8 = tpu.iota {dimensions = array<i32: 1>} : vector<32x32xi32>
    %9 = vector.broadcast %7 : vector<32x1xf32> to vector<32x32xf32>
    %10 = arith.cmpf oeq, %5, %9 : vector<32x32xf32>
    %c32_i32 = arith.constant 32 : i32
    %11 = vector.broadcast %c32_i32 : i32 to vector<32x32xi32>
    %12 = arith.select %10, %8, %11 : vector<32x32xi1>, vector<32x32xi32>
    %cst_7 = arith.constant dense<2147483647> : vector<32xi32>
    %13 = vector.multi_reduction <minsi>, %12, %cst_7 [1] : vector<32x32xi32> to vector<32xi32>
    %14 = vector.shape_cast %13 : vector<32xi32> to vector<32x1xi32>
    %15 = vector.broadcast %14 : vector<32x1xi32> to vector<32x32xi32>
    %16 = arith.cmpi eq, %8, %15 : vector<32x32xi32>
    %17 = arith.extui %16 : vector<32x32xi1> to vector<32x32xi32>
    %18 = arith.sitofp %17 : vector<32x32xi32> to vector<32x32xf32>
    %c0_8 = arith.constant 0 : index
    %c0_9 = arith.constant 0 : index
    %19 = vector.load %arg4[%c0_8, %c0_9] : memref<32x96xf32, #tpu.memory_space<vmem>>, vector<32x96xf32>
    %cst_10 = arith.constant dense<0.000000e+00> : vector<32x96xf32>
    %20 = tpu.matmul %18, %19, %cst_10 {dimension_numbers = #tpu.dot_dimension_numbers<[1], [0], [0], [1], [0, 0, 1, 1], [], []>} : vector<32x32xf32>, vector<32x96xf32>, vector<32x96xf32> -> vector<32x96xf32>
    %21 = arith.mulf %0, %20 : vector<32x96xf32>
    %c0_11 = arith.constant 0 : index
    %c0_12 = arith.constant 0 : index
    %22 = vector.load %arg5[%c0_11, %c0_12] : memref<96x3xf32, #tpu.memory_space<vmem>>, vector<96x3xf32>
    %cst_13 = arith.constant dense<0.000000e+00> : vector<32x3xf32>
    %23 = tpu.matmul %21, %22, %cst_13 {dimension_numbers = #tpu.dot_dimension_numbers<[1], [0], [0], [1], [0, 0, 1, 1], [], []>} : vector<32x96xf32>, vector<96x3xf32>, vector<32x3xf32> -> vector<32x3xf32>
    %c0_14 = arith.constant 0 : index
    %c0_15 = arith.constant 0 : index
    %24 = vector.load %arg6[%c0_14, %c0_15] : memref<32x3xf32, #tpu.memory_space<vmem>>, vector<32x3xf32>
    tpu.vector_store %arg6[%c0_14, %c0_15], %23 {strides = array<i32>} : memref<32x3xf32, #tpu.memory_space<vmem>>, vector<32x3xf32>,
    return
  }
  func.func @transform_0(%arg0: i32) -> (i32, i32) {
    %c0_i32 = arith.constant 0 : i32
    %c0_i32_0 = arith.constant 0 : i32
    return %arg0, %c0_i32 : i32, i32
  }
  func.func @transform_1(%arg0: i32) -> (i32, i32) {
    %c0_i32 = arith.constant 0 : i32
    %c0_i32_0 = arith.constant 0 : i32
    %c0_i32_1 = arith.constant 0 : i32
    return %c0_i32, %c0_i32_0 : i32, i32
  }
  func.func @transform_2(%arg0: i32) -> (i32, i32) {
    %c0_i32 = arith.constant 0 : i32
    %c0_i32_0 = arith.constant 0 : i32
    %c0_i32_1 = arith.constant 0 : i32
    return %c0_i32, %c0_i32_0 : i32, i32
  }
  func.func @transform_3(%arg0: i32) -> (i32, i32) {
    %c0_i32 = arith.constant 0 : i32
    %c0_i32_0 = arith.constant 0 : i32
    %c0_i32_1 = arith.constant 0 : i32
    return %c0_i32, %c0_i32_0 : i32, i32
  }
  func.func @transform_4(%arg0: i32) -> (i32, i32) {
    %c0_i32 = arith.constant 0 : i32
    %c0_i32_0 = arith.constant 0 : i32
    %c0_i32_1 = arith.constant 0 : i32
    return %c0_i32, %c0_i32_0 : i32, i32
  }
  func.func @transform_5(%arg0: i32) -> (i32, i32) {
    %c0_i32 = arith.constant 0 : i32
    %c0_i32_0 = arith.constant 0 : i32
    return %arg0, %c0_i32 : i32, i32
  }
}

</mosaic_0001>

<bundles_post_ra>
// kernel: tpu_custom_call.1
= control target key start
LH: loop header
LB: loop body
LE: loop exit
PB: predicated region body
PF: predicated region fallthrough
CT: control target
= control target key end

     0   :  { %vm36_vm0 = vcmask 785408   ;;  %vm247_vm1 = vcmask 261120   ;;  %v260_v56 = vlaneseq  ;;  %vm556_vm14 = vcmask 23552   ;;  %s1063_s1 = inlined_call_operand.vmem [shape: f32[96,96], index: 1, kind: input, shape index: {}]   ;;  %s1064_s0 = inlined_call_operand.vmem [shape: f32[32,96], index: 0, kind: input, shape index: {}]   ;;  %s1065_s2 = inlined_call_operand.vmem [shape: f32[96,32], index: 2, kind: input, shape index: {}]   ;;  %s1066_s3 = inlined_call_operand.vmem [shape: f32[32,96], index: 3, kind: input, shape index: {}]   ;;  %s1067_s4 = inlined_call_operand.vmem [shape: f32[96,3], index: 4, kind: input, shape index: {}]   ;;  %s1068_s5 = inlined_call_operand.vmem [shape: f32[32,3], index: 5, kind: output, shape index: {}]  }
   0x1   :  { %v24_v0 = vld [vmem:[%s1063_s1] sm:$0xff]  ;;  %v25_v1 = vld [vmem:[%s1063_s1 + $0x8] sm:$0xff]  ;;  %v26_v2 = vld [vmem:[%s1063_s1 + $0x10] sm:$0xff] }
   0x2   :  { %v745_v3 = vpack.c.bf16 %v25_v1, %v24_v0  ;;  %v27_v4 = vld [vmem:[%s1063_s1 + $0x18] sm:$0xff]  ;;  %v28_v6 = vld [vmem:[%s1063_s1 + $0x20] sm:$0xff]  ;;  %v29_v7 = vld [vmem:[%s1063_s1 + $0x28] sm:$0xff]  ;;  %v969_v57 = vand.u32 127, %v260_v56 }
   0x3   :  { %v749_v5 = vpack.c.bf16 %v27_v4, %v26_v2  ;;  %v878_v8 = vld [vmem:[%s1064_s0] sm:$0xff]  ;;  %v753_v9 = vpack.c.bf16 %v29_v7, %v28_v6  ;;  %v30_v10 = vld [vmem:[%s1063_s1 + $0x30] sm:$0xff]  ;;  %v139_v12 = vld [vmem:[%s1065_s2 + $0x8] sm:$0xff] }
   0x4   :  { %746 = vmatprep.subr.bf16.mxu0 %v745_v3  ;;  %665 = vmatprep.mubr.msk.f32.mxu0 %vm36_vm0, %v878_v8  ;;  %v138_v11 = vld [vmem:[%s1065_s2] sm:$0xff]  ;;  %v31_v13 = vld [vmem:[%s1063_s1 + $0x38] sm:$0xff]  ;;  %v140_v15 = vld [vmem:[%s1065_s2 + $0x10] sm:$0xff] }
   0x5   :  { %748 = vmatpush3.bf16.msra.mxu0 %v745_v3  ;;  %v769_v14 = vpack.c.bf16 %v139_v12, %v138_v11  ;;  %v141_v16 = vld [vmem:[%s1065_s2 + $0x18] sm:$0xff]  ;;  %v142_v18 = vld [vmem:[%s1065_s2 + $0x20] sm:$0xff]  ;;  %v143_v19 = vld [vmem:[%s1065_s2 + $0x28] sm:$0xff]  ;;  %v757_v20 = vpack.c.bf16 %v31_v13, %v30_v10 }
   0x6   :  { %750 = vmatprep.subr.bf16.mxu0 %v749_v5  ;;  %v773_v17 = vpack.c.bf16 %v141_v16, %v140_v15  ;;  %v32_v21 = vld [vmem:[%s1063_s1 + $0x40] sm:$0xff]  ;;  %v33_v22 = vld [vmem:[%s1063_s1 + $0x48] sm:$0xff]  ;;  %v777_v23 = vpack.c.bf16 %v143_v19, %v142_v18  ;;  %v144_v24 = vld [vmem:[%s1065_s2 + $0x30] sm:$0xff] }
   0x7   :  { %770 = vmatprep.subr.bf16.mxu1 %v769_v14  ;;  %v145_v25 = vld [vmem:[%s1065_s2 + $0x38] sm:$0xff]  ;;  %v761_v26 = vpack.c.bf16 %v33_v22, %v32_v21  ;;  %v34_v27 = vld [vmem:[%s1063_s1 + $0x50] sm:$0xff]  ;;  %v146_v30 = vld [vmem:[%s1065_s2 + $0x40] sm:$0xff] }
   0x8   :  { %772 = vmatpush3.bf16.msra.mxu1 %v769_v14  ;;  %v35_v28 = vld [vmem:[%s1063_s1 + $0x58] sm:$0xff]  ;;  %v781_v29 = vpack.c.bf16 %v145_v25, %v144_v24  ;;  %v147_v31 = vld [vmem:[%s1065_s2 + $0x48] sm:$0xff]  ;;  %v938_v35 = vld [vmem:[%s1064_s0 + $0x10] sm:$0xff] }
   0x9   :  { %752 = vmatpush3.bf16.msra.mxu0 %v749_v5  ;;  %774 = vmatprep.subr.bf16.mxu1 %v773_v17  ;;  %v765_v32 = vpack.c.bf16 %v35_v28, %v34_v27  ;;  %v785_v33 = vpack.c.bf16 %v147_v31, %v146_v30  ;;  %v933_v34 = vld [vmem:[%s1064_s0 + $0x8] sm:$0xff]  ;;  %v947_v36 = vld [vmem:[%s1064_s0 + $0x18] sm:$0xff]  ;;  %v148_v37 = vld [vmem:[%s1065_s2 + $0x50] sm:$0xff] }
   0xa   :  { %754 = vmatprep.subr.bf16.mxu0 %v753_v9  ;;  %v149_v38 = vld [vmem:[%s1065_s2 + $0x58] sm:$0xff]  ;;  %v342_v31 = vld [vmem:[%s1066_s3] sm:$0xff] }
   0xb   :  { %v789_v39 = vpack.c.bf16 %v149_v38, %v148_v37  ;;  %v344_v37 = vld [vmem:[%s1066_s3 + $0x10] sm:$0xff]  ;;  %v345_v38 = vld [vmem:[%s1066_s3 + $0x18] sm:$0xff] }
   0xc   :  { %776 = vmatpush3.bf16.msra.mxu1 %v773_v17 }
   0xd   :  { %756 = vmatpush3.bf16.msra.mxu0 %v753_v9  ;;  %778 = vmatprep.subr.bf16.mxu1 %v777_v23 }
   0xe   :  { %758 = vmatprep.subr.bf16.mxu0 %v757_v20 }
  0x10   :  { %780 = vmatpush3.bf16.msra.mxu1 %v777_v23 }
  0x11   :  { %760 = vmatpush3.bf16.msra.mxu0 %v757_v20  ;;  %782 = vmatprep.subr.bf16.mxu1 %v781_v29 }
  0x12   :  { %762 = vmatprep.subr.bf16.mxu0 %v761_v26 }
  0x14   :  { %784 = vmatpush3.bf16.msra.mxu1 %v781_v29 }
  0x15   :  { %764 = vmatpush3.bf16.msra.mxu0 %v761_v26  ;;  %786 = vmatprep.subr.bf16.mxu1 %v785_v33 }
  0x16   :  { %766 = vmatprep.subr.bf16.mxu0 %v765_v32 }
  0x18   :  { %788 = vmatpush3.bf16.msra.mxu1 %v785_v33 }
  0x19   :  { %768 = vmatpush3.bf16.msra.mxu0 %v765_v32  ;;  %790 = vmatprep.subr.bf16.mxu1 %v789_v39  ;;  %v343_v32 = vld [vmem:[%s1066_s3 + $0x8] sm:$0xff] }
  0x1a   :  { %v793_v33 = vpack.c.bf16 %v343_v32, %v342_v31 }
  0x1c   :  { %666 = vmatmul.mubr.msk.f32.vlgmr.msra.gmra.mrb[0].mxu0 %vm36_vm0, %v933_v34  ;;  %792 = vmatpush3.bf16.msra.mxu1 %v789_v39  ;;  %v797_v39 = vpack.c.bf16 %v345_v38, %v344_v37 }
  0x1d   :  { %668 = vmatprep.mubr.msk.f32.mxu0 %vm36_vm0, %v938_v35  ;;  %794 = vmatprep.subr.bf16.mxu0 %v793_v33 }
  0x1e   :  { %796 = vmatpush3.bf16.msra.mxu0 %v793_v33 }
  0x1f   :  { %798 = vmatprep.subr.bf16.mxu0 %v797_v39 }
  0x20   :  { %669 = vmatmul.mubr.msk.f32.gmra.mrb[2].mxu0 %vm36_vm0, %v947_v36 }
  0x22   :  { %800 = vmatpush3.bf16.msra.mxu0 %v797_v39 }
  0xef   :  { %v667_v40 = vpop.f32.mrb[0].mxu0 }
  0xf0   :  { %v115_v41 = vpop.f32.mrb[1].mxu0  ;;  %v135_v43 = vmul.f32 %v667_v40, %v933_v34  ;;  %v447_v40 = vld [vmem:[%s1067_s4] sm:$0xff] }
  0xf1   :  { %v134_v42 = vmul.f32 %v115_v41, %v878_v8  ;;  %v448_v41 = vld [vmem:[%s1067_s4 + $0x8] sm:$0xff] }
  0xf3   :  { %v670_v44 = vpop.f32.mrb[2].mxu0  ;;  %695 = vmatprep.mubr.msk.f32.mxu1 %vm36_vm0, %v134_v42  ;;  %v449_v42 = vld [vmem:[%s1067_s4 + $0x10] sm:$0xff] }
  0xf4   :  { %v125_v45 = vpop.f32.mrb[3].mxu0  ;;  %696 = vmatmul.mubr.msk.f32.vlgmr.msra.gmra.mrb[0].mxu1 %vm36_vm0, %v135_v43  ;;  %v137_v47 = vmul.f32 %v670_v44, %v947_v36  ;;  %v801_v43 = vpack.c.bf16 %v448_v41, %v447_v40  ;;  %v450_v44 = vld [vmem:[%s1067_s4 + $0x18] sm:$0xff] }
  0xf5   :  { %v136_v46 = vmul.f32 %v125_v45, %v938_v35  ;;  %v805_v45 = vpack.c.bf16 %v450_v44, %v449_v42 }
  0xf6   :  { %802 = vmatprep.subr.bf16.mxu1 %v801_v43 }
  0xf7   :  { %698 = vmatprep.mubr.msk.f32.mxu1 %vm36_vm0, %v136_v46  ;;  %v451_v46 = vld [vmem:[%s1067_s4 + $0x20] sm:$0xff]  ;;  %804 = vmatpush3.bf16.msra.mxu1 %v801_v43 }
  0xf8   :  { %699 = vmatmul.mubr.msk.f32.gmra.mrb[2].mxu1 %vm36_vm0, %v137_v47  ;;  %v452_v47 = vld [vmem:[%s1067_s4 + $0x28] sm:$0xff]  ;;  %806 = vmatprep.subr.bf16.mxu1 %v805_v45 }
  0xfb   :  { %808 = vmatpush3.bf16.msra.mxu1 %v805_v45 }
 0x1c7   :  { %v697_v48 = vpop.f32.mrb[0].mxu1 }
 0x1c8   :  { %v228_v49 = vpop.f32.mrb[1].mxu1  ;;  %v251_v53 = vsel %vm247_vm1, %v697_v48, -inf }
 0x1c9   :  { %v248_v50 = vsel %vm247_vm1, %v228_v49, -inf }
 0x1ca   :  { %249 = vmax.xlane.f32.xlu0 %v248_v50  ;;  %v454_v50 = vld [vmem:[%s1067_s4 + $0x38] sm:$0xff] }
 0x1cb   :  { %v700_v51 = vpop.f32.mrb[2].mxu1 }
 0x1cc   :  { %v238_v52 = vpop.f32.mrb[3].mxu1  ;;  %v257_v55 = vsel %vm247_vm1, %v700_v51, -inf }
 0x1cd   :  { %v254_v54 = vsel %vm247_vm1, %v238_v52, -inf }
 0x1ce   :  { %252 = vmax.xlane.f32.xlu0 %v251_v53  ;;  %255 = vmax.xlane.f32.xlu1 %v254_v54  ;;  %v456_v53 = vld [vmem:[%s1067_s4 + $0x48] sm:$0xff] }
 0x1d2   :  { %258 = vmax.xlane.f32.xlu1 %v257_v55 }
 0x257   :  { %v250_v58 = vpop.xlane.xlu0 %249 }
 0x258   :  { %vm262_vm2 = vcmp.eq.f32.partialorder %v228_v49, %v250_v58  ;;  %v453_v49 = vld [vmem:[%s1067_s4 + $0x30] sm:$0xff] }
 0x259   :  { %v266_v59 = vsel %vm262_vm2, %v969_v57, 32 }
 0x25a   :  { %v270_v60 = vsel %vm247_vm1, %v266_v59, 2147483647 }
 0x25b   :  { %v253_v61 = vpop.xlane.xlu0 %252  ;;  %v256_v62 = vpop.xlane.xlu1 %255  ;;  %v272_v63 = vshra.s32 %v270_v60, 16  ;;  %v271_v15 = vand.u32 65535, %v270_v60 }
 0x25c   :  { %vm263_vm3 = vcmp.eq.f32.partialorder %v697_v48, %v253_v61  ;;  %vm264_vm4 = vcmp.eq.f32.partialorder %v238_v52, %v256_v62  ;;  %v809_v48 = vpack.c.bf16 %v452_v47, %v451_v46  ;;  %v455_v52 = vld [vmem:[%s1067_s4 + $0x40] sm:$0xff] }
 0x25d   :  { %v267_v0 = vsel %vm263_vm3, %v969_v57, 32  ;;  %v268_v1 = vsel %vm264_vm4, %v969_v57, 32  ;;  %v274_v2 = vcvt.s32.f32 %v272_v63  ;;  %v273_v17 = vcvt.s32.f32 %v271_v15 }
 0x25e   :  { %v285_v3 = vsel %vm247_vm1, %v267_v0, 2147483647  ;;  %v300_v4 = vsel %vm247_vm1, %v268_v1, 2147483647  ;;  %810 = vmatprep.subr.bf16.mxu1 %v809_v48  ;;  %v817_v54 = vpack.c.bf16 %v456_v53, %v455_v52 }
 0x25f   :  { %275 = vmin.xlane.f32.xlu0 %v274_v2  ;;  %v259_v5 = vpop.xlane.xlu1 %258  ;;  %v287_v6 = vshra.s32 %v285_v3, 16  ;;  %v302_v7 = vshra.s32 %v300_v4, 16  ;;  %v301_v18 = vand.u32 65535, %v300_v4  ;;  %v286_v19 = vand.u32 65535, %v285_v3  ;;  %812 = vmatpush3.bf16.msra.mxu1 %v809_v48 }
 0x260   :  { %vm265_vm5 = vcmp.eq.f32.partialorder %v700_v51, %v259_v5  ;;  %v813_v51 = vpack.c.bf16 %v454_v50, %v453_v49 }
 0x261   :  { %v269_v9 = vsel %vm265_vm5, %v969_v57, 32  ;;  %v289_v10 = vcvt.s32.f32 %v287_v6  ;;  %v304_v11 = vcvt.s32.f32 %v302_v7  ;;  %v303_v23 = vcvt.s32.f32 %v301_v18  ;;  %v457_v18 = vld [vmem:[%s1067_s4 + $0x50] sm:$0xff] }
 0x262   :  { %v315_v12 = vsel %vm247_vm1, %v269_v9, 2147483647  ;;  %v288_v24 = vcvt.s32.f32 %v286_v19  ;;  %814 = vmatprep.subr.bf16.mxu1 %v813_v51  ;;  %v826_v6 = vmov 0.0   ;;  %v458_v19 = vld [vmem:[%s1067_s4 + $0x58] sm:$0xff] }
 0x263   :  { %290 = vmin.xlane.f32.xlu1 %v289_v10  ;;  %305 = vmin.xlane.f32.xlu0 %v304_v11  ;;  %v317_v13 = vshra.s32 %v315_v12, 16  ;;  %v316_v25 = vand.u32 65535, %v315_v12 }
 0x264   :  { %816 = vmatpush3.bf16.msra.mxu1 %v813_v51 }
 0x265   :  { %v319_v14 = vcvt.s32.f32 %v317_v13  ;;  %v318_v29 = vcvt.s32.f32 %v316_v25  ;;  %818 = vmatprep.subr.bf16.mxu1 %v817_v54 }
 0x267   :  { %320 = vmin.xlane.f32.xlu1 %v319_v14 }
 0x268   :  { %820 = vmatpush3.bf16.msra.mxu1 %v817_v54 }
 0x2ec   :  { %v979_v16 = vpop.xlane.xlu0 %275 }
 0x2ed   :  { %vm277_vm6 = vcmp.eq.f32.partialorder %v274_v2, %v979_v16  ;;  %v282_v55 = vcvt.f32.s32 %v979_v16 }
 0x2ee   :  { %v278_v20 = vsel %vm277_vm6, %v273_v17, inf }
 0x2ef   :  { %279 = vmin.xlane.f32.xlu0 %v278_v20  ;;  %v283_v60 = vshll.u32 %v282_v55, 16  ;;  %v821_v20 = vpack.c.bf16 %v458_v19, %v457_v18 }
 0x2f0   :  { %v306_v21 = vpop.xlane.xlu0 %305  ;;  %v291_v22 = vpop.xlane.xlu1 %290 }
 0x2f1   :  { %vm307_vm7 = vcmp.eq.f32.partialorder %v304_v11, %v306_v21  ;;  %vm292_vm8 = vcmp.eq.f32.partialorder %v289_v10, %v291_v22  ;;  %v312_v56 = vcvt.f32.s32 %v306_v21  ;;  %v297_v58 = vcvt.f32.s32 %v291_v22  ;;  %822 = vmatprep.subr.bf16.mxu1 %v821_v20 }
 0x2f2   :  { %v308_v26 = vsel %vm307_vm7, %v303_v23, inf  ;;  %v293_v27 = vsel %vm292_vm8, %v288_v24, inf  ;;  %824 = vmatpush3.bf16.msra.mxu1 %v821_v20 }
 0x2f3   :  { %309 = vmin.xlane.f32.xlu0 %v308_v26  ;;  %294 = vmin.xlane.f32.xlu1 %v293_v27  ;;  %v313_v63 = vshll.u32 %v312_v56, 16  ;;  %v298_v0 = vshll.u32 %v297_v58, 16 }
 0x2f4   :  { %v982_v28 = vpop.xlane.xlu1 %320 }
 0x2f5   :  { %vm322_vm9 = vcmp.eq.f32.partialorder %v319_v14, %v982_v28  ;;  %v327_v3 = vcvt.f32.s32 %v982_v28 }
 0x2f6   :  { %v323_v30 = vsel %vm322_vm9, %v318_v29, inf }
 0x2f7   :  { %324 = vmin.xlane.f32.xlu1 %v323_v30  ;;  %v328_v12 = vshll.u32 %v327_v3, 16 }
 0x37c   :  { %v280_v59 = vpop.xlane.xlu0 %279 }
 0x37d   :  { %v281_v61 = vcvt.f32.s32 %v280_v59 }
 0x37f   :  { %v284_v62 = vadd.s32 %v283_v60, %v281_v61 }
 0x380   :  { %v310_v1 = vpop.xlane.xlu0 %309  ;;  %v295_v2 = vpop.xlane.xlu1 %294 }
 0x381   :  { %v311_v4 = vcvt.f32.s32 %v310_v1  ;;  %v296_v5 = vcvt.f32.s32 %v295_v2  ;;  %vm330_vm10 = vcmp.eq.s32.totalorder %v969_v57, %v284_v62 }
 0x382   :  { %v573_v7 = vsel %vm330_vm10, 1.0, %v826_v6 }
 0x383   :  { %v314_v9 = vadd.s32 %v313_v63, %v311_v4  ;;  %v299_v10 = vadd.s32 %v298_v0, %v296_v5  ;;  %709 = vmatprep.mubr.msk.f32.mxu0 %vm247_vm1, %v573_v7 }
 0x384   :  { %v325_v11 = vpop.xlane.xlu1 %324 }
 0x385   :  { %vm332_vm11 = vcmp.eq.s32.totalorder %v969_v57, %v314_v9  ;;  %vm331_vm12 = vcmp.eq.s32.totalorder %v969_v57, %v299_v10  ;;  %v326_v13 = vcvt.f32.s32 %v325_v11 }
 0x386   :  { %v574_v14 = vsel %vm331_vm12, 1.0, %v826_v6  ;;  %v575_v15 = vsel %vm332_vm11, 1.0, %v826_v6 }
 0x387   :  { %v329_v16 = vadd.s32 %v328_v12, %v326_v13  ;;  %710 = vmatmul.mubr.msk.f32.vlgmr.msra.gmra.mrb[4].mxu0 %vm247_vm1, %v574_v14 }
 0x388   :  { %712 = vmatprep.mubr.msk.f32.mxu0 %vm247_vm1, %v575_v15 }
 0x389   :  { %vm333_vm13 = vcmp.eq.s32.totalorder %v969_v57, %v329_v16 }
 0x38a   :  { %v576_v17 = vsel %vm333_vm13, 1.0, %v826_v6 }
 0x38b   :  { %713 = vmatmul.mubr.msk.f32.gmra.mrb[6].mxu0 %vm247_vm1, %v576_v17 }
 0x45a   :  { %v711_v21 = vpop.f32.mrb[4].mxu0 }
 0x45b   :  { %v424_v22 = vpop.f32.mrb[5].mxu0  ;;  %v444_v57 = vmul.f32 %v711_v21, %v933_v34 }
 0x45c   :  { %v443_v23 = vmul.f32 %v424_v22, %v878_v8 }
 0x45e   :  { %v714_v24 = vpop.f32.mrb[6].mxu0  ;;  %739 = vmatprep.mubr.msk.f32.mxu1 %vm36_vm0, %v443_v23 }
 0x45f   :  { %v434_v25 = vpop.f32.mrb[7].mxu0  ;;  %740 = vmatmul.mubr.msk.f32.vlgmr.msra.gmra.mrb[4].mxu1 %vm36_vm0, %v444_v57  ;;  %v446_v27 = vmul.f32 %v714_v24, %v947_v36 }
 0x460   :  { %v445_v26 = vmul.f32 %v434_v25, %v938_v35 }
 0x462   :  { %742 = vmatprep.mubr.msk.f32.mxu1 %vm36_vm0, %v445_v26 }
 0x463   :  { %743 = vmatmul.mubr.msk.f32.gmra.mrb[6].mxu1 %vm36_vm0, %v446_v27 }
 0x532   :  { %v741_v28 = vpop.f32.mrb[4].mxu1 }
 0x533   :  { %558 = vst.msk [vmem:[%s1068_s5 + $0x8] sm:$0xff] %vm556_vm14, %v741_v28  ;;  %v537_v8 = vpop.f32.mrb[5].mxu1 }
 0x534   :  { %557 = vst.msk [vmem:[%s1068_s5] sm:$0xff] %vm556_vm14, %v537_v8 }
 0x536   :  { %v744_v34 = vpop.f32.mrb[6].mxu1 }
 0x537   :  { %560 = vst.msk [vmem:[%s1068_s5 + $0x18] sm:$0xff] %vm556_vm14, %v744_v34  ;;  %v547_v35 = vpop.f32.mrb[7].mxu1 }
 0x538   :  { %559 = vst.msk [vmem:[%s1068_s5 + $0x10] sm:$0xff] %vm556_vm14, %v547_v35 }

</bundles_post_ra>
